<compile_context>
chip_gen: v5e
topology: v5e:2x2
jax: 0.10.0
libtpu: 0.0.40
codegen_flags: <defaults>
</compile_context>

<pallas_src>
import functools

import jax
import jax.numpy as jnp
from jax.experimental import pallas as pl
from jax.experimental.pallas import tpu as pltpu

IN_F = 10
HID_F = 200
OUT_F = 10
BN_EPS = 1e-5

_TILE_B_MAX = 4096  # rows per grid step for large batches


# ---------------------------------------------------------------------------
# Kernels (transposed layout: batch on the lane dimension)
# ---------------------------------------------------------------------------
def _kernel_y_only(xT_ref, w0t_ref, b0_ref, w1t_ref, b1_ref, yT_ref):
    """yT = W1^T @ relu(W0'^T @ xT + b0) + b1 ; hidden stays in VMEM."""
    h = jnp.dot(w0t_ref[...], xT_ref[...],
                preferred_element_type=jnp.float32)            # (200, tile_b)
    h = jnp.maximum(h + b0_ref[...], 0.0)                      # BN folded + ReLU
    y = jnp.dot(w1t_ref[...], h,
                preferred_element_type=jnp.float32)            # (10, tile_b)
    yT_ref[...] = y + b1_ref[...]


def _kernel_full(xT_ref, w0t_ref, b0_ref, w1t_ref, b1_ref, hT_ref, yT_ref):
    """Same as above but also writes the layer0 output (return_full_list=True)."""
    h = jnp.dot(w0t_ref[...], xT_ref[...],
                preferred_element_type=jnp.float32)
    h = jnp.maximum(h + b0_ref[...], 0.0)
    hT_ref[...] = h
    y = jnp.dot(w1t_ref[...], h,
                preferred_element_type=jnp.float32)
    yT_ref[...] = y + b1_ref[...]


# ---------------------------------------------------------------------------
# Parameters
# ---------------------------------------------------------------------------
def init_params(key):
    """Deterministic parameter init matching the module's shapes (torch-style)."""
    k = jax.random.split(key, 6)
    lim0 = 1.0 / jnp.sqrt(10.0)
    lim1 = 1.0 / jnp.sqrt(200.0)
    return {
        # stored (in_features, out_features), i.e. transposed relative to torch
        "w0": jax.random.uniform(k[0], (IN_F, HID_F), jnp.float32, -lim0, lim0),
        "b0": jax.random.uniform(k[1], (HID_F,), jnp.float32, -lim0, lim0),
        # BatchNorm1d(200) parameters / running stats
        "gamma": jnp.ones((HID_F,), jnp.float32),
        "beta": jnp.zeros((HID_F,), jnp.float32),
        "running_mean": 0.05 * jax.random.normal(k[2], (HID_F,), jnp.float32),
        "running_var": 1.0 + 0.1 * jax.random.uniform(k[3], (HID_F,), jnp.float32),
        "w1": jax.random.uniform(k[4], (HID_F, OUT_F), jnp.float32, -lim1, lim1),
        "b1": jax.random.uniform(k[5], (OUT_F,), jnp.float32, -lim1, lim1),
    }


def prepare_params(params):
    """One-time prep: fold eval-mode BatchNorm into W0/b0 and pre-transpose
    everything into the kernel's feature-major layout."""
    scale = params["gamma"] / jnp.sqrt(params["running_var"] + BN_EPS)   # (200,)
    shift = params["beta"] - params["running_mean"] * scale              # (200,)
    w0_folded = params["w0"] * scale[None, :]                            # (10, 200)
    b0_folded = params["b0"] * scale + shift                             # (200,)
    return {
        "w0t": jnp.asarray(w0_folded.T, jnp.float32),                    # (200, 10)
        "b0": b0_folded.reshape(HID_F, 1).astype(jnp.float32),           # (200, 1)
        "w1t": jnp.asarray(params["w1"].T, jnp.float32),                 # (10, 200)
        "b1": params["b1"].reshape(OUT_F, 1).astype(jnp.float32),        # (10, 1)
    }


# ---------------------------------------------------------------------------
# Tiling
# ---------------------------------------------------------------------------
def _round_up(n, m):
    return ((n + m - 1) // m) * m


def _choose_tiling(B):
    """Pad B to a lane-friendly multiple and pick (tile_b, padded_B, grid).

    * Small / mid batches: pad to a multiple of 256 and split into exactly two
      tiles so both v7x TensorCores get work (grid >= 2), tiles stay <= 4096.
    * Large batches: fixed 4096-row tiles + cdiv grid (constant, near-optimal
      step count for any B; padded rows are sliced off in the wrapper).
    """
    Bp = _round_up(max(B, 1), 256)
    if Bp <= 2 * _TILE_B_MAX:
        tile_b = max(128, Bp // 2)
        Bp = 2 * tile_b
    else:
        tile_b = _TILE_B_MAX
        Bp = _round_up(B, tile_b)
    return tile_b, Bp, Bp // tile_b


# ---------------------------------------------------------------------------
# Forward
# ---------------------------------------------------------------------------
@functools.partial(jax.jit, static_argnames=("return_full_list",))
def classifier_forward(x, prep, return_full_list=False):
    x = x.astype(jnp.float32)
    B = x.shape[0]
    tile_b, Bp, grid_steps = _choose_tiling(B)

    # Batch-on-lanes layout: pad the batch, then transpose once in the wrapper.
    xT = jnp.pad(x, ((0, Bp - B), (0, 0))).T                    # (10, Bp)

    x_spec = pl.BlockSpec((IN_F, tile_b), lambda i: (0, i))
    w0_spec = pl.BlockSpec((HID_F, IN_F), lambda i: (0, 0))
    b0_spec = pl.BlockSpec((HID_F, 1), lambda i: (0, 0))
    w1_spec = pl.BlockSpec((OUT_F, HID_F), lambda i: (0, 0))
    b1_spec = pl.BlockSpec((OUT_F, 1), lambda i: (0, 0))
    y_spec = pl.BlockSpec((OUT_F, tile_b), lambda i: (0, i))
    h_spec = pl.BlockSpec((HID_F, tile_b), lambda i: (0, i))

    cp = pltpu.CompilerParams(dimension_semantics=("parallel",))
    args = (xT, prep["w0t"], prep["b0"], prep["w1t"], prep["b1"])
    in_specs = [x_spec, w0_spec, b0_spec, w1_spec, b1_spec]

    if return_full_list:
        hT, yT = pl.pallas_call(
            _kernel_full,
            out_shape=(
                jax.ShapeDtypeStruct((HID_F, Bp), jnp.float32),   # layer0 output^T
                jax.ShapeDtypeStruct((OUT_F, Bp), jnp.float32),   # layer1 output^T
            ),
            grid=(grid_steps,),
            in_specs=in_specs,
            out_specs=(h_spec, y_spec),
            compiler_params=cp,
        )(*args)
        h = hT[:, :B].T                                           # (B, 200)
        y = yT[:, :B].T                                           # (B, 10)
        return [h, y]

    yT = pl.pallas_call(
        _kernel_y_only,
        out_shape=jax.ShapeDtypeStruct((OUT_F, Bp), jnp.float32),
        grid=(grid_steps,),
        in_specs=in_specs,
        out_specs=y_spec,
        compiler_params=cp,
    )(*args)
    return yT[:, :B].T                                            # (B, 10)


# ---------------------------------------------------------------------------
# Test
# ---------------------------------------------------------------------------
if __name__ == "__main__":
    key = jax.random.PRNGKey(0)
    k_params, k_x = jax.random.split(key)

    params = init_params(k_params)
    prep = prepare_params(params)                       # one-time parameter prep
    x = jax.random.normal(k_x, (8, IN_F), jnp.float32)  # batch=8, in_features=10

    # Run kernel (both return modes), block on results.
    y = classifier_forward(x, prep, return_full_list=False)
    outs = classifier_forward(x, prep, return_full_list=True)
    jax.block_until_ready(y)
    jax.block_until_ready(outs)

    assert y.shape == (8, OUT_F)
    assert outs[0].shape == (8, HID_F) and outs[1].shape == (8, OUT_F)

    # Sanity check against a plain-JAX reference of the original (unfolded) math.
    scale = params["gamma"] / jnp.sqrt(params["running_var"] + BN_EPS)
    shift = params["beta"] - params["running_mean"] * scale
    h_ref = jnp.maximum((x @ params["w0"] + params["b0"]) * scale + shift, 0.0)
    y_ref = h_ref @ params["w1"] + params["b1"]
    assert jnp.allclose(y, y_ref, atol=1e-4, rtol=1e-4)
    assert jnp.allclose(outs[0], h_ref, atol=1e-4, rtol=1e-4)
    assert jnp.allclose(outs[1], y_ref, atol=1e-4, rtol=1e-4)

    print("KERNEL_OK")
</pallas_src>

<mosaic_0001>
module attributes {stable_mosaic.version = 11 : i64} {
  func.func @_kernel_y_only(%arg0: i32, %arg1: memref<10x128xf32, #tpu.memory_space<vmem>>, %arg2: memref<200x10xf32, #tpu.memory_space<vmem>>, %arg3: memref<200x1xf32, #tpu.memory_space<vmem>>, %arg4: memref<10x200xf32, #tpu.memory_space<vmem>>, %arg5: memref<10x1xf32, #tpu.memory_space<vmem>>, %arg6: memref<10x128xf32, #tpu.memory_space<vmem>>) attributes {dimension_semantics = [#tpu.dimension_semantics<parallel>], iteration_bounds = array<i64: 2>, scalar_prefetch = 0 : i64, scratch_operands = 0 : i64, tpu.core_type = #tpu.core_type<tc>, window_params = [{transform_indices = @transform_0, window_bounds = array<i64: 10, 128>}, {pipeline_mode = #tpu.pipeline_mode<synchronous>, transform_indices = @transform_1, window_bounds = array<i64: 200, 10>}, {pipeline_mode = #tpu.pipeline_mode<synchronous>, transform_indices = @transform_2, window_bounds = array<i64: 200, 1>}, {pipeline_mode = #tpu.pipeline_mode<synchronous>, transform_indices = @transform_3, window_bounds = array<i64: 10, 200>}, {pipeline_mode = #tpu.pipeline_mode<synchronous>, transform_indices = @transform_4, window_bounds = array<i64: 10, 1>}, {transform_indices = @transform_5, window_bounds = array<i64: 10, 128>}]} {
    %c0 = arith.constant 0 : index
    %c0_0 = arith.constant 0 : index
    %0 = vector.load %arg2[%c0, %c0_0] : memref<200x10xf32, #tpu.memory_space<vmem>>, vector<200x10xf32>
    %c0_1 = arith.constant 0 : index
    %c0_2 = arith.constant 0 : index
    %1 = vector.load %arg1[%c0_1, %c0_2] : memref<10x128xf32, #tpu.memory_space<vmem>>, vector<10x128xf32>
    %cst = arith.constant dense<0.000000e+00> : vector<200x128xf32>
    %2 = tpu.matmul %0, %1, %cst {dimension_numbers = #tpu.dot_dimension_numbers<[1], [0], [0], [1], [0, 0, 1, 1], [], []>} : vector<200x10xf32>, vector<10x128xf32>, vector<200x128xf32> -> vector<200x128xf32>
    %c0_3 = arith.constant 0 : index
    %c0_4 = arith.constant 0 : index
    %3 = vector.load %arg3[%c0_3, %c0_4] : memref<200x1xf32, #tpu.memory_space<vmem>>, vector<200x1xf32>
    %4 = vector.broadcast %3 : vector<200x1xf32> to vector<200x128xf32>
    %5 = arith.addf %2, %4 : vector<200x128xf32>
    %cst_5 = arith.constant 0.000000e+00 : f32
    %6 = vector.broadcast %cst_5 : f32 to vector<200x128xf32>
    %7 = arith.maximumf %5, %6 : vector<200x128xf32>
    %c0_6 = arith.constant 0 : index
    %c0_7 = arith.constant 0 : index
    %8 = vector.load %arg4[%c0_6, %c0_7] : memref<10x200xf32, #tpu.memory_space<vmem>>, vector<10x200xf32>
    %cst_8 = arith.constant dense<0.000000e+00> : vector<10x128xf32>
    %9 = tpu.matmul %8, %7, %cst_8 {dimension_numbers = #tpu.dot_dimension_numbers<[1], [0], [0], [1], [0, 0, 1, 1], [], []>} : vector<10x200xf32>, vector<200x128xf32>, vector<10x128xf32> -> vector<10x128xf32>
    %c0_9 = arith.constant 0 : index
    %c0_10 = arith.constant 0 : index
    %10 = vector.load %arg5[%c0_9, %c0_10] : memref<10x1xf32, #tpu.memory_space<vmem>>, vector<10x1xf32>
    %11 = vector.broadcast %10 : vector<10x1xf32> to vector<10x128xf32>
    %12 = arith.addf %9, %11 : vector<10x128xf32>
    %c0_11 = arith.constant 0 : index
    %c0_12 = arith.constant 0 : index
    %13 = vector.load %arg6[%c0_11, %c0_12] : memref<10x128xf32, #tpu.memory_space<vmem>>, vector<10x128xf32>
    tpu.vector_store %arg6[%c0_11, %c0_12], %12 {strides = array<i32>} : memref<10x128xf32, #tpu.memory_space<vmem>>, vector<10x128xf32>,
    return
  }
  func.func @transform_0(%arg0: i32) -> (i32, i32) {
    %c0_i32 = arith.constant 0 : i32
    %c0_i32_0 = arith.constant 0 : i32
    return %c0_i32, %arg0 : i32, i32
  }
  func.func @transform_1(%arg0: i32) -> (i32, i32) {
    %c0_i32 = arith.constant 0 : i32
    %c0_i32_0 = arith.constant 0 : i32
    %c0_i32_1 = arith.constant 0 : i32
    return %c0_i32, %c0_i32_0 : i32, i32
  }
  func.func @transform_2(%arg0: i32) -> (i32, i32) {
    %c0_i32 = arith.constant 0 : i32
    %c0_i32_0 = arith.constant 0 : i32
    %c0_i32_1 = arith.constant 0 : i32
    return %c0_i32, %c0_i32_0 : i32, i32
  }
  func.func @transform_3(%arg0: i32) -> (i32, i32) {
    %c0_i32 = arith.constant 0 : i32
    %c0_i32_0 = arith.constant 0 : i32
    %c0_i32_1 = arith.constant 0 : i32
    return %c0_i32, %c0_i32_0 : i32, i32
  }
  func.func @transform_4(%arg0: i32) -> (i32, i32) {
    %c0_i32 = arith.constant 0 : i32
    %c0_i32_0 = arith.constant 0 : i32
    %c0_i32_1 = arith.constant 0 : i32
    return %c0_i32, %c0_i32_0 : i32, i32
  }
  func.func @transform_5(%arg0: i32) -> (i32, i32) {
    %c0_i32 = arith.constant 0 : i32
    %c0_i32_0 = arith.constant 0 : i32
    return %c0_i32, %arg0 : i32, i32
  }
}

</mosaic_0001>

<bundles_post_ra>
// kernel: classifier_forward.1
= control target key start
LH: loop header
LB: loop body
LE: loop exit
PB: predicated region body
PF: predicated region fallthrough
CT: control target
= control target key end

     0   :  { %s933_s18 = smov 0   ;;  %s935_s19 = smov 0   ;;  %s1214_s0 = inlined_call_operand.vmem [shape: f32[10,256], index: 0, kind: input, shape index: {}]   ;;  %s1215_s1 = inlined_call_operand.vmem [shape: f32[200,10], index: 1, kind: input, shape index: {}]   ;;  %s1216_s2 = inlined_call_operand.vmem [shape: f32[200,1], index: 2, kind: input, shape index: {}]   ;;  %s1217_s3 = inlined_call_operand.vmem [shape: f32[10,200], index: 3, kind: input, shape index: {}]   ;;  %s1218_s4 = inlined_call_operand.vmem [shape: f32[10,1], index: 4, kind: input, shape index: {}]   ;;  %s1219_s5 = inlined_call_operand.vmem [shape: f32[10,256], index: 5, kind: output, shape index: {}]  }
   0x1   :  { %s937_s20 = smov 0  }
   0x2 LB: > { %s805_s21 = sadd.s32 4294967295, %s900_s20   ;;  %s950_s22 = sadd.s32 1, %s900_s20   ;;  %s900_s20 = sphi %s937_s20, %s1223_s20   ;;  %s896_s19 = sphi %s935_s19, %s1222_s19   ;;  %s892_s18 = sphi %s933_s18, %s1221_s18  }
   0x3   : > { %s19_s23 = ssub.s32 %s900_s20, %s950_s22  ;;  %s22_s24 = sadd.s32 1, %s896_s19 }
   0x4   : > { %p20_p0 = scmp.eq.s32.totalorder %s19_s23, 0  ;;  %p29_p1 = scmp.ne.s32.totalorder %s896_s19, %s892_s18 }
   0x5   : > { %p30_p2 = scmp.eq.s32.totalorder %s900_s20, 0  ;;  %p143_p3 = scmp.eq.s32.totalorder %s805_s21, 1 }
   0x6   : > { %s961_s25 = scalar_select %p20_p0, %s896_s19, %s22_s24  }
   0x7   : > { %p31_p4 = por %p30_p2, %p29_p1  ;;  %p963_p5 = por %p143_p3, %p29_p1 }
   0x8   : > { %p808_p6 = scmp.ge.s32.totalorder %s900_s20, 2 }
   0xa   : > { %177 = sbr.rel (%p808_p6) target bundleno = 21 (0x15), region = 32 }
   0xf   : > { %180 = sbr.rel (!%p31_p4) target bundleno = 21 (0x15), region = 36  ;;  %s182_s27 = sand.u32 (%p31_p4), 1, %s896_s19  }
  0x10   : > { %s810_s28 = sshll.u32 (%p31_p4), %s900_s20, 3  ;;  %s809_s29 = sshll.u32 (%p31_p4), %s182_s27, 4 }
  0x11   : > { %s186_s7 = scalar_lea.vmem (%p31_p4), %s1214_s0, %s810_s28  ;;  %s184_s8 = scalar_lea.vmem (%p31_p4), [#allocation2], %s809_s29 }
  0x12   : > { %v217_v0 = vld [vmem:[%s186_s7] sm:$0xff] (%p31_p4)  ;;  %v219_v1 = vld [vmem:[%s186_s7 + $0x10] sm:$0xff] (%p31_p4) }
  0x13   : > { %218 = vst [vmem:[%s184_s8] sm:$0xff] (%p31_p4), %v217_v0 }
  0x14   : > { %220 = vst [vmem:[%s184_s8 + $0x8] sm:$0xff] %v219_v1 }
  0x15 PF: > { %p811_p7 = scmp.ge.s32.totalorder %s900_s20, 1  ;;  %p225_p8 = scmp.lt.s32.totalorder %s900_s20, 3 }
  0x17   : > { %p226_p9 = pnand %p811_p7, %p225_p8 }
  0x18   : > { %s232_s13 = sand.u32 (!%p226_p9), 1, %s892_s18  }
  0x19   : > { %229 = sbr.rel (%p226_p9) target bundleno = 406 (0x196), region = 74  ;;  %s982_s14 = sshll.u32 (!%p226_p9), %s232_s13, 4 }
  0x1a   : > { %s234_s17 = scalar_lea.vmem (!%p226_p9), [#allocation2], %s982_s14  ;;  %s257_s16 = scalar_lea.vmem (!%p226_p9), [#allocation3], %s982_s14 }
  0x1e   : > { %v300_v2 = vld [vmem:[%s1216_s2 + $0x78] sm:$0xff]  ;;  %v298_v3 = vld [vmem:[%s1216_s2 + $0x68] sm:$0xff]  ;;  %v902_v4 = vmov 0   ;;  %vm511_vm0 = vcmask 1041408   ;;  %v283_v7 = vld [vmem:[%s234_s17] sm:$0xff]  ;;  %vm435_vm1 = vcmask 80896  }
  0x1f   : > { %876 = vset.pattern.permute.xlu1 %v902_v4  ;;  %875 = vset.pattern.permute.xlu0 %v902_v4  ;;  %v296_v5 = vld [vmem:[%s1216_s2 + $0x58] sm:$0xff]  ;;  %v258_v8 = vld [vmem:[%s1215_s1] sm:$0xff]  ;;  %v267_v9 = vld [vmem:[%s1215_s1 + $0x48] sm:$0xff]  ;;  %vm648_vm2 = vcmask 588800  }
  0x20   : > { %387 = vperm.xlu0 %875, %v300_v2   ;;  %377 = vperm.xlu1 %876, %v298_v3   ;;  %v284_v6 = vld [vmem:[%s234_s17 + $0x8] sm:$0x3]  ;;  %v274_v10 = vld [vmem:[%s1215_s1 + $0x80] sm:$0xff]  ;;  %v299_v11 = vld [vmem:[%s1216_s2 + $0x70] sm:$0xff]  ;;  %s843_s17 = sshll.u32 (%p963_p5), %s805_s21, 3 }
  0x21   : > { %877 = vset.pattern.permute.xlu2 %v902_v4  ;;  %814 = vmatpush.msk.msra.mxu0 %vm511_vm0, %v284_v6  ;;  %v297_v12 = vld [vmem:[%s1216_s2 + $0x60] sm:$0xff]  ;;  %v295_v13 = vld [vmem:[%s1216_s2 + $0x50] sm:$0xff]  ;;  %v259_v14 = vld [vmem:[%s1215_s1 + $0x8] sm:$0xff]  ;;  %s711_s24 = scalar_lea.vmem (%p963_p5), %s1219_s5, %s843_s17 }
  0x22   : > { %846 = vmatpush.msk.msra.mxu2 %vm511_vm0, %v284_v6  ;;  %847 = vmatpush.msk.msra.mxu3 %vm511_vm0, %v284_v6  ;;  %v268_v15 = vld [vmem:[%s1215_s1 + $0x50] sm:$0xff]  ;;  %v275_v16 = vld [vmem:[%s1215_s1 + $0x88] sm:$0xff]  ;;  %v309_v17 = vld [vmem:[%s1216_s2 + $0xc0] sm:$0xff] }
  0x23   : > { %367 = vperm.xlu2 %877, %v296_v5   ;;  %530 = vmatpush.msra.mxu0 %v283_v7  ;;  %v294_v18 = vld [vmem:[%s1216_s2 + $0x48] sm:$0xff]  ;;  %v308_v19 = vld [vmem:[%s1216_s2 + $0xb8] sm:$0xff]  ;;  %v260_v20 = vld [vmem:[%s1215_s1 + $0x10] sm:$0xff] }
  0x24   : > { %848 = vmatpush.msra.mxu2 %v283_v7  ;;  %849 = vmatpush.msra.mxu3 %v283_v7  ;;  %v269_v21 = vld [vmem:[%s1215_s1 + $0x58] sm:$0xff]  ;;  %v276_v22 = vld [vmem:[%s1215_s1 + $0x90] sm:$0xff]  ;;  %v293_v24 = vld [vmem:[%s1216_s2 + $0x40] sm:$0xff] }
  0x25   : > { %815 = vmatmul.msk.f32.vlgmr.msra.gmra.mxu0 %vm435_vm1, %v258_v8  ;;  %824 = vmatmul.msk.f32.vlgmr.msra.gmra.mxu2 %vm435_vm1, %v267_v9  ;;  %v307_v23 = vld [vmem:[%s1216_s2 + $0xb0] sm:$0xff]  ;;  %v292_v25 = vld [vmem:[%s1216_s2 + $0x38] sm:$0xff]  ;;  %v270_v27 = vld [vmem:[%s1215_s1 + $0x60] sm:$0xff] }
  0x26   : > { %831 = vmatmul.msk.f32.vlgmr.msra.gmra.mxu3 %vm435_vm1, %v274_v10  ;;  %v261_v26 = vld [vmem:[%s1215_s1 + $0x18] sm:$0xff]  ;;  %v306_v29 = vld [vmem:[%s1216_s2 + $0xa8] sm:$0xff]  ;;  %v291_v30 = vld [vmem:[%s1216_s2 + $0x30] sm:$0xff] }
  0x27   : > { %v277_v28 = vld [vmem:[%s1215_s1 + $0x98] sm:$0xff]  ;;  %v305_v31 = vld [vmem:[%s1216_s2 + $0xa0] sm:$0xff]  ;;  %v271_v33 = vld [vmem:[%s1215_s1 + $0x68] sm:$0xff] }
  0x28   : > { %382 = vperm.xlu0 %875, %v299_v11   ;;  %372 = vperm.xlu1 %876, %v297_v12   ;;  %v262_v32 = vld [vmem:[%s1215_s1 + $0x20] sm:$0xff]  ;;  %v304_v35 = vld [vmem:[%s1216_s2 + $0x98] sm:$0xff]  ;;  %v290_v36 = vld [vmem:[%s1216_s2 + $0x28] sm:$0xff] }
  0x29   : > { %v278_v34 = vld [vmem:[%s1215_s1 + $0xa0] sm:$0xff]  ;;  %v263_v38 = vld [vmem:[%s1215_s1 + $0x28] sm:$0xff]  ;;  %v272_v39 = vld [vmem:[%s1215_s1 + $0x70] sm:$0xff] }
  0x2a   : > { %v289_v37 = vld [vmem:[%s1216_s2 + $0x20] sm:$0xff]  ;;  %v279_v40 = vld [vmem:[%s1215_s1 + $0xa8] sm:$0xff]  ;;  %v303_v41 = vld [vmem:[%s1216_s2 + $0x90] sm:$0xff] }
  0x2b   : > { %362 = vperm.xlu2 %877, %v295_v13   ;;  %v288_v42 = vld [vmem:[%s1216_s2 + $0x18] sm:$0xff]  ;;  %v302_v43 = vld [vmem:[%s1216_s2 + $0x88] sm:$0xff]  ;;  %v264_v44 = vld [vmem:[%s1215_s1 + $0x30] sm:$0xff] }
  0x2c   : > { %v273_v45 = vld [vmem:[%s1215_s1 + $0x78] sm:$0xff]  ;;  %v280_v46 = vld [vmem:[%s1215_s1 + $0xb0] sm:$0xff]  ;;  %v301_v47 = vld [vmem:[%s1216_s2 + $0x80] sm:$0xff] }
  0x2d   : > { %816 = vmatmul.msk.f32.gmra.mxu0 %vm435_vm1, %v259_v14  ;;  %825 = vmatmul.msk.f32.gmra.mxu2 %vm435_vm1, %v268_v15  ;;  %v287_v48 = vld [vmem:[%s1216_s2 + $0x10] sm:$0xff]  ;;  %v286_v49 = vld [vmem:[%s1216_s2 + $0x8] sm:$0xff]  ;;  %v265_v50 = vld [vmem:[%s1215_s1 + $0x38] sm:$0xff] }
  0x2e   : > { %832 = vmatmul.msk.f32.gmra.mxu3 %vm435_vm1, %v275_v16  ;;  %v281_v51 = vld [vmem:[%s1215_s1 + $0xb8] sm:$0xff]  ;;  %v285_v52 = vld [vmem:[%s1216_s2] sm:$0xff]  ;;  %v637_v54 = vld [vmem:[%s1218_s4 + $0x8] sm:$0x3] }
  0x2f   : > { %v636_v53 = vld [vmem:[%s1218_s4] sm:$0xff] }
  0x30   : > { %432 = vperm.xlu0 %875, %v309_v17   ;;  %357 = vperm.xlu1 %876, %v294_v18   ;;  %v266_v55 = vld [vmem:[%s1215_s1 + $0x40] sm:$0xff] }
  0x31   : > { %v282_v56 = vld [vmem:[%s1215_s1 + $0xc0] sm:$0xff] }
  0x33   : > { %427 = vperm.xlu2 %877, %v308_v19  }
  0x35   : > { %817 = vmatmul.msk.f32.gmra.mxu0 %vm435_vm1, %v260_v20  ;;  %826 = vmatmul.msk.f32.gmra.mxu2 %vm435_vm1, %v269_v21 }
  0x36   : > { %833 = vmatmul.msk.f32.gmra.mxu3 %vm435_vm1, %v276_v22 }
  0x38   : > { %422 = vperm.xlu1 %876, %v307_v23   ;;  %352 = vperm.xlu0 %875, %v293_v24  }
  0x3b   : > { %347 = vperm.xlu2 %877, %v292_v25  }
  0x3d   : > { %818 = vmatmul.msk.f32.gmra.mxu0 %vm435_vm1, %v261_v26  ;;  %827 = vmatmul.msk.f32.gmra.mxu2 %vm435_vm1, %v270_v27 }
  0x3e   : > { %834 = vmatmul.msk.f32.gmra.mxu3 %vm435_vm1, %v277_v28 }
  0x40   : > { %417 = vperm.xlu0 %875, %v306_v29   ;;  %342 = vperm.xlu1 %876, %v291_v30  }
  0x43   : > { %412 = vperm.xlu2 %877, %v305_v31  }
  0x45   : > { %819 = vmatmul.msk.f32.gmra.mxu0 %vm435_vm1, %v262_v32  ;;  %828 = vmatmul.msk.f32.gmra.mxu2 %vm435_vm1, %v271_v33 }
  0x46   : > { %835 = vmatmul.msk.f32.gmra.mxu3 %vm435_vm1, %v278_v34 }
  0x48   : > { %407 = vperm.xlu1 %876, %v304_v35   ;;  %337 = vperm.xlu0 %875, %v290_v36  }
  0x4b   : > { %332 = vperm.xlu2 %877, %v289_v37  }
  0x4d   : > { %820 = vmatmul.msk.f32.gmra.mxu0 %vm435_vm1, %v263_v38  ;;  %829 = vmatmul.msk.f32.gmra.mxu2 %vm435_vm1, %v272_v39 }
  0x4e   : > { %836 = vmatmul.msk.f32.gmra.mxu3 %vm435_vm1, %v279_v40 }
  0x50   : > { %402 = vperm.xlu0 %875, %v303_v41   ;;  %327 = vperm.xlu1 %876, %v288_v42  }
  0x53   : > { %397 = vperm.xlu2 %877, %v302_v43  }
  0x55   : > { %821 = vmatmul.msk.f32.gmra.mxu0 %vm435_vm1, %v264_v44  ;;  %830 = vmatmul.msk.f32.gmra.mxu2 %vm435_vm1, %v273_v45 }
  0x56   : > { %837 = vmatmul.msk.f32.gmra.mxu3 %vm435_vm1, %v280_v46 }
  0x58   : > { %392 = vperm.xlu1 %876, %v301_v47   ;;  %322 = vperm.xlu0 %875, %v287_v48  }
  0x5b   : > { %317 = vperm.xlu2 %877, %v286_v49  }
  0x5d   : > { %822 = vmatmul.msk.f32.gmra.mxu0 %vm435_vm1, %v265_v50 }
  0x5e   : > { %838 = vmatmul.msk.f32.gmra.mxu3 %vm435_vm1, %v281_v51 }
  0x60   : > { %312 = vperm.xlu0 %875, %v285_v52   ;;  %640 = vperm.xlu1 %876, %v636_v53  }
  0x63   : > { %645 = vperm.xlu2 %877, %v637_v54  }
  0x65   : > { %823 = vmatmul.msk.f32.gmra.mxu0 %vm435_vm1, %v266_v55 }
  0x66   : > { %839 = vmatmul.msk.f32.gmra.mxu3 %vm435_vm1, %v282_v56 }
  0x7d   : > { %v368_v61 = vpop.permute.xlu2 %367 }
  0x85   : > { %v363_v4 = vpop.permute.xlu2 %362 }
  0x8d   : > { %v428_v10 = vpop.permute.xlu2 %427 }
  0x92   : > { %v388_v57 = vpop.permute.xlu0 %387  ;;  %v378_v0 = vpop.permute.xlu1 %377 }
  0x95   : > { %v348_v16 = vpop.permute.xlu2 %347 }
  0x9a   : > { %v383_v63 = vpop.permute.xlu0 %382  ;;  %v373_v6 = vpop.permute.xlu1 %372 }
  0x9d   : > { %v413_v24 = vpop.permute.xlu2 %412 }
  0xa2   : > { %v1160_v58 = vpop.f32.mrf.mxu0  ;;  %v433_v5 = vpop.permute.xlu0 %432 }
  0xa3   : > { %v358_v14 = vpop.permute.xlu1 %357 }
  0xa5   : > { %v333_v35 = vpop.permute.xlu2 %332 }
  0xa8   : > { %v559_v59 = vpop.f32.mrf.mxu2 }
  0xa9   : > { %v1162_v60 = vpop.f32.mrf.mxu3  ;;  %v560_v46 = vadd.f32 %v559_v59, %v358_v14 }
  0xaa   : > { %v1164_v62 = vpop.f32.mrf.mxu0  ;;  %v353_v11 = vpop.permute.xlu0 %352 }
  0xab   : > { %v423_v21 = vpop.permute.xlu1 %422  ;;  %v616_v51 = vmax.f32 %v560_v46, 0.0 }
  0xad   : > { %v398_v50 = vpop.permute.xlu2 %397 }
  0xb0   : > { %v562_v1 = vpop.f32.mrf.mxu2 }
  0xb1   : > { %v1166_v2 = vpop.f32.mrf.mxu3  ;;  %v563_v43 = vadd.f32 %v562_v1, %v363_v4 }
  0xb2   : > { %v1168_v3 = vpop.f32.mrf.mxu0  ;;  %v418_v19 = vpop.permute.xlu0 %417 }
  0xb3   : > { %v343_v27 = vpop.permute.xlu1 %342  ;;  %v617_v48 = vmax.f32 %v563_v43, 0.0 }
  0xb8   : > { %v565_v7 = vpop.f32.mrf.mxu2 }
  0xb9   : > { %v1170_v8 = vpop.f32.mrf.mxu3  ;;  %v566_v39 = vadd.f32 %v565_v7, %v368_v61 }
  0xba   : > { %v1172_v9 = vpop.f32.mrf.mxu0  ;;  %v338_v26 = vpop.permute.xlu0 %337 }
  0xbb   : > { %v408_v41 = vpop.permute.xlu1 %407  ;;  %v618_v47 = vmax.f32 %v566_v39, 0.0 }
  0xc0   : > { %v568_v12 = vpop.f32.mrf.mxu2 }
  0xc1   : > { %v1174_v13 = vpop.f32.mrf.mxu3  ;;  %v569_v36 = vadd.f32 %v568_v12, %v373_v6 }
  0xc2   : > { %v544_v15 = vpop.f32.mrf.mxu0  ;;  %v403_v38 = vpop.permute.xlu0 %402 }
  0xc3   : > { %v619_v44 = vmax.f32 %v569_v36, 0.0  ;;  %v545_v6 = vadd.f32 %v544_v15, %v333_v35 }
  0xc8   : > { %v571_v17 = vpop.f32.mrf.mxu2 }
  0xc9   : > { %v592_v18 = vpop.f32.mrf.mxu3  ;;  %v572_v33 = vadd.f32 %v571_v17, %v378_v0 }
  0xca   : > { %v547_v20 = vpop.f32.mrf.mxu0  ;;  %v323_v53 = vpop.permute.xlu0 %322 }
  0xcb   : > { %v620_v40 = vmax.f32 %v572_v33, 0.0  ;;  %v548_v0 = vadd.f32 %v547_v20, %v338_v26  ;;  %v590_v20 = vadd.f32 %v1174_v13, %v408_v41 }
  0xcd   : > { %v612_v17 = vmax.f32 %v548_v0, 0.0 }
  0xd0   : > { %v574_v22 = vpop.f32.mrf.mxu2 }
  0xd1   : > { %v595_v23 = vpop.f32.mrf.mxu3  ;;  %v575_v30 = vadd.f32 %v574_v22, %v383_v63  ;;  %v328_v63 = vpop.permute.xlu1 %327  ;;  %v539_v22 = vadd.f32 %v1168_v3, %v323_v53 }
  0xd2   : > { %v550_v25 = vpop.f32.mrf.mxu0  ;;  %v596_v7 = vadd.f32 %v595_v23, %v418_v19  ;;  %v542_v14 = vadd.f32 %v1172_v9, %v328_v63  ;;  %v313_v15 = vpop.permute.xlu0 %312  ;;  %v587_v19 = vadd.f32 %v1170_v8, %v403_v38 }
  0xd3   : > { %v621_v37 = vmax.f32 %v575_v30, 0.0  ;;  %v551_v55 = vadd.f32 %v550_v25, %v343_v27  ;;  %v626_v27 = vmax.f32 %v590_v20, 0.0  ;;  %v609_v13 = vmax.f32 %v539_v22, 0.0 }
  0xd4   : > { %v628_v25 = vmax.f32 %v596_v7, 0.0  ;;  %v610_v23 = vmax.f32 %v542_v14, 0.0  ;;  %v625_v3 = vmax.f32 %v587_v19, 0.0 }
  0xd8   : > { %v577_v28 = vpop.f32.mrf.mxu2 }
  0xd9   : > { %v598_v29 = vpop.f32.mrf.mxu3  ;;  %v578_v31 = vadd.f32 %v577_v28, %v388_v57  ;;  %v533_v28 = vadd.f32 %v1160_v58, %v313_v15  ;;  %v633_v58 = vld [vmem:[%s1217_s3 + $0x8] sm:$0xff] }
  0xda   : > { %v553_v32 = vpop.f32.mrf.mxu0  ;;  %v599_v1 = vadd.f32 %v598_v29, %v423_v21  ;;  %v611_v21 = vmax.f32 %v545_v6, 0.0 }
  0xdb   : > { %v622_v34 = vmax.f32 %v578_v31, 0.0  ;;  %v554_v52 = vadd.f32 %v553_v32, %v348_v16  ;;  %v593_v16 = vadd.f32 %v592_v18, %v413_v24  ;;  %v393_v18 = vpop.permute.xlu1 %392  ;;  %v584_v24 = vadd.f32 %v1166_v2, %v398_v50  ;;  %v635_v32 = vld [vmem:[%s1217_s3 + $0x18] sm:$0x3] }
  0xdc   : > { %v581_v29 = vadd.f32 %v1162_v60, %v393_v18  ;;  %v607_v31 = vmax.f32 %v533_v28, 0.0  ;;  %v634_v60 = vld [vmem:[%s1217_s3 + $0x10] sm:$0x3] }
  0xdd   : > { %655 = vmatpush.msra.mxu1 %v622_v34  ;;  %v614_v59 = vmax.f32 %v554_v52, 0.0  ;;  %v627_v26 = vmax.f32 %v593_v16, 0.0  ;;  %v624_v8 = vmax.f32 %v584_v24, 0.0 }
  0xde   : > { %v623_v2 = vmax.f32 %v581_v29, 0.0 }
  0xdf   : > { %656 = vmatpush.msra.mxu1 %v621_v37 }
  0xe1   : > { %v601_v42 = vpop.f32.mrf.mxu3  ;;  %657 = vmatpush.msra.mxu1 %v620_v40 }
  0xe2   : > { %v556_v45 = vpop.f32.mrf.mxu0  ;;  %v602_v56 = vadd.f32 %v601_v42, %v428_v10  ;;  %v629_v10 = vmax.f32 %v599_v1, 0.0 }
  0xe3   : > { %658 = vmatpush.msra.mxu1 %v619_v44  ;;  %v557_v49 = vadd.f32 %v556_v45, %v353_v11  ;;  %v613_v11 = vmax.f32 %v551_v55, 0.0  ;;  %v641_v34 = vpop.permute.xlu1 %640 }
  0xe4   : > { %v630_v12 = vmax.f32 %v602_v56, 0.0 }
  0xe5   : > { %659 = vmatpush.msra.mxu1 %v618_v47  ;;  %v615_v57 = vmax.f32 %v557_v49, 0.0 }
  0xe7   : > { %660 = vmatpush.msra.mxu1 %v617_v48 }
  0xe9   : > { %v604_v54 = vpop.f32.mrf.mxu3  ;;  %661 = vmatpush.msra.mxu1 %v616_v51 }
  0xea   : > { %v605_v61 = vadd.f32 %v604_v54, %v433_v5  ;;  %v318_v5 = vpop.permute.xlu2 %317 }
  0xeb   : > { %662 = vmatpush.msra.mxu1 %v615_v57  ;;  %v536_v9 = vadd.f32 %v1164_v62, %v318_v5  ;;  %v632_v62 = vld [vmem:[%s1217_s3] sm:$0xff] }
  0xec   : > { %v631_v4 = vmax.f32 %v605_v61, 0.0 }
  0xed   : > { %663 = vmatpush.msra.mxu1 %v614_v59  ;;  %v608_v30 = vmax.f32 %v536_v9, 0.0 }
  0xee   : > { %685 = vmatpush.msrb.mxu2 %v631_v4 }
  0xef   : > { %664 = vmatpush.msra.mxu1 %v613_v11 }
  0xf0   : > { %686 = vmatpush.msrb.mxu2 %v630_v12 }
  0xf1   : > { %665 = vmatpush.msra.mxu1 %v612_v17 }
  0xf2   : > { %687 = vmatpush.msrb.mxu2 %v629_v10  ;;  %v646_v39 = vpop.permute.xlu2 %645 }
  0xf3   : > { %666 = vmatpush.msra.mxu1 %v611_v21 }
  0xf4   : > { %688 = vmatpush.msrb.mxu2 %v628_v25 }
  0xf5   : > { %667 = vmatpush.msra.mxu1 %v610_v23 }
  0xf6   : > { %689 = vmatpush.msrb.mxu2 %v627_v26 }
  0xf7   : > { %668 = vmatpush.msra.mxu1 %v609_v13 }
  0xf8   : > { %690 = vmatpush.msrb.mxu2 %v626_v27 }
  0xf9   : > { %669 = vmatpush.msra.mxu1 %v608_v30 }
  0xfa   : > { %691 = vmatpush.msrb.mxu2 %v625_v3 }
  0xfb   : > { %670 = vmatpush.msra.mxu1 %v607_v31 }
  0xfc   : > { %692 = vmatpush.msrb.mxu2 %v624_v8  ;;  %671 = vmatmul.f32.vlgmr.msra.gmra.mxu1 %v632_v62 }
  0xfe   : > { %693 = vmatpush.msrb.mxu2 %v623_v2 }
  0xff   : > { %840 = vmatmul.msk.f32.vlgmr.msrb.gmra.mxu2 %vm648_vm2, %v633_v58 }
 0x104   : > { %674 = vmatmul.f32.gmra.mxu1 %v634_v60 }
 0x107   : > { %841 = vmatmul.msk.f32.gmra.mxu2 %vm648_vm2, %v635_v32 }
 0x179   : > { %v672_v33 = vpop.f32.mrf.mxu1 }
 0x17a   : > { %v673_v35 = vadd.f32 %v672_v33, %v641_v34 }
 0x181   : > { %v675_v38 = vpop.f32.mrf.mxu1 }
 0x182   : > { %v695_v36 = vpop.f32.mrf.mxu2  ;;  %v676_v40 = vadd.f32 %v675_v38, %v646_v39 }
 0x183   : > { %v696_v37 = vadd.f32 %v695_v36, %v673_v35 }
 0x185   : > { %701 = vst [vmem:[%s257_s16] sm:$0xff] %v696_v37 }
 0x189   : > { %709 = sbr.rel (!%p963_p5) target bundleno = 406 (0x196), region = 82 }
 0x18a   : > { %v698_v41 = vpop.f32.mrf.mxu2 }
 0x18b   : > { %v699_v42 = vadd.f32 %v698_v41, %v676_v40 }
 0x18c   : > { %v742_v43 = vld [vmem:[%s257_s16] sm:$0xff] (%p963_p5) }
 0x18d   : > { %702 = vst [vmem:[%s257_s16 + $0x8] sm:$0x3] %v699_v42 }
 0x18e   : > { %743 = vst [vmem:[%s711_s24] sm:$0xff] %v742_v43 }
 0x194   : > { %v744_v44 = vld [vmem:[%s257_s16 + $0x8] sm:$0xff] }
 0x195   : > { %745 = vst [vmem:[%s711_s24 + $0x10] sm:$0xff] %v744_v44 }
 0x196 PF: > { %p12_p10 = scmp.ge.s32.totalorder %s950_s22, 4   ;;  %s1221_s18 = smov %s896_s19 }
 0x197   : > { %s1222_s19 = smov %s961_s25  ;;  %s1223_s20 = smov %s950_s22 }
 0x198   :  { %14 = sbr.rel (!%p12_p10) target bundleno = 2 (0x2), region = 151 }

</bundles_post_ra>
